<compile_context>
chip_gen: v6e
topology: v6e:2x2x1
jax: 0.10.0
libtpu: 0.0.40
codegen_flags: <defaults>
</compile_context>

<pallas_src>
import functools

import jax
import jax.numpy as jnp
from jax.experimental import pallas as pl
from jax.experimental.pallas import tpu as pltpu

LANES = 128
SUBLANES = 8


def _hazy_loss_kernel(pred_ref, truth_ref, tgt_ref, out_ref, *,
                      block_rows, total_rows, masked):
    # pred/truth/tgt refs : [block_rows, 128] blocks (native dtype)
    # out_ref             : [8, 128] f32 partial sum for this grid step
    i = pl.program_id(0)

    x = pred_ref[...].astype(jnp.float32)
    t = truth_ref[...].astype(jnp.float32)
    g = tgt_ref[...].astype(jnp.float32)

    # Numerically stable sigmoid (matches torch.sigmoid / jax.nn.sigmoid):
    # one EUP exp + one EUP reciprocal shared by both branches.
    z = jnp.exp(-jnp.abs(x))                     # in (0, 1], never overflows
    r = pl.reciprocal(1.0 + z, approx=False)
    p = jnp.where(x >= 0, r, z * r)

    # nn.BCELoss(reduction='none'): clamp log at -100 *before* mixing with
    # t / (1 - t), exactly like PyTorch (avoids 0 * -inf NaNs).
    log_p = jnp.maximum(jnp.log(p), -100.0)
    log_1mp = jnp.maximum(jnp.log(1.0 - p), -100.0)
    loss = -(t * log_p + (1.0 - t) * log_1mp)

    # weight = (1 - g) * p + g * (1 - p) == p + g * (1 - 2p)   (fewer VALU ops)
    weight = p + g * (1.0 - 2.0 * p)
    lw = loss * weight

    if masked:
        # Emitted only when rows % block_rows != 0: zero the padded rows of
        # the partial last block.  `where` also discards any NaN/inf produced
        # from the unspecified out-of-bounds buffer contents.
        row = jax.lax.broadcasted_iota(jnp.int32, lw.shape, 0) + i * block_rows
        lw = jnp.where(row < total_rows, lw, 0.0)

    # (8,128)-tile-aligned partial reduction; the expensive cross-lane reduce
    # is deferred to the wrapper (runs once over a tiny array).
    out_ref[...] = jnp.sum(lw.reshape(block_rows // SUBLANES, SUBLANES, LANES),
                           axis=0)


def _elementwise_lw(x, t, g):
    """Pure-JAX loss*weight (used only for the <128-element flat tail)."""
    x = x.astype(jnp.float32)
    t = t.astype(jnp.float32)
    g = g.astype(jnp.float32)
    p = jax.nn.sigmoid(x)
    log_p = jnp.maximum(jnp.log(p), -100.0)
    log_1mp = jnp.maximum(jnp.log(1.0 - p), -100.0)
    loss = -(t * log_p + (1.0 - t) * log_1mp)
    weight = p + g * (1.0 - 2.0 * p)
    return loss * weight


def hazy_loss(prediction, truth, transformed_ground_truth, *, block_rows=1024):
    """mean( BCE(sigmoid(pred), truth) * [(1-tgt)*p + tgt*(1-p)] ) -> 0-d f32."""
    assert prediction.shape == truth.shape == transformed_ground_truth.shape
    total = int(prediction.size)
    rows = total // LANES
    tail = total - rows * LANES

    pred_flat = prediction.reshape(-1)
    truth_flat = truth.reshape(-1)
    tgt_flat = transformed_ground_truth.reshape(-1)

    # Flat tail (< 128 elements): trivial pure-JAX expression, no padding.
    tail_sum = jnp.float32(0.0)
    if tail:
        tail_sum = jnp.sum(_elementwise_lw(pred_flat[rows * LANES:],
                                           truth_flat[rows * LANES:],
                                           tgt_flat[rows * LANES:]))
    if rows == 0:
        return tail_sum / jnp.float32(total)

    # Lane-dense bulk view -- no jnp.pad, no dtype cast in the wrapper.
    def bulk(a):
        a = a if tail == 0 else a[: rows * LANES]
        return a.reshape(rows, LANES)

    x2, t2, g2 = bulk(pred_flat), bulk(truth_flat), bulk(tgt_flat)

    # block_rows: multiple of 8, >= 8, no larger than the (8-rounded) row count.
    block_rows = max(
        SUBLANES,
        (min(block_rows, -(-rows // SUBLANES) * SUBLANES) // SUBLANES) * SUBLANES)
    num_blocks = -(-rows // block_rows)
    masked = (rows % block_rows) != 0

    kernel = functools.partial(_hazy_loss_kernel, block_rows=block_rows,
                               total_rows=rows, masked=masked)
    blk = pl.BlockSpec((block_rows, LANES), lambda i: (i, 0))

    partials = pl.pallas_call(
        kernel,
        out_shape=jax.ShapeDtypeStruct((num_blocks * SUBLANES, LANES), jnp.float32),
        grid_spec=pltpu.PrefetchScalarGridSpec(
            num_scalar_prefetch=0,
            grid=(num_blocks,),
            in_specs=[blk, blk, blk],
            out_specs=pl.BlockSpec((SUBLANES, LANES), lambda i: (i, 0)),
        ),
        compiler_params=pltpu.CompilerParams(
            # Independent grid steps (per-step partial-sum outputs) -> lets
            # Mosaic shard the grid across both TensorCores on v7x.
            dimension_semantics=("parallel",)),
    )(x2, t2, g2)

    return (jnp.sum(partials) + tail_sum) / jnp.float32(total)


def _reference(prediction, truth, transformed_ground_truth):
    """Pure-JAX mirror of the PyTorch HazyLoss forward."""
    p = jax.nn.sigmoid(prediction)
    weight = (1.0 - transformed_ground_truth) * p + transformed_ground_truth * (1.0 - p)
    log_p = jnp.maximum(jnp.log(p), -100.0)        # BCELoss clamps log at -100
    log_1mp = jnp.maximum(jnp.log(1.0 - p), -100.0)
    loss = -(truth * log_p + (1.0 - truth) * log_1mp)
    return jnp.mean(loss * weight)


if __name__ == "__main__":
    key = jax.random.PRNGKey(0)
    k1, k2, k3 = jax.random.split(key, 3)
    shape = (2, 4, 16, 16)  # prediction logits, truth/tgt in [0, 1]
    prediction = jax.random.normal(k1, shape, dtype=jnp.float32)
    truth = jax.random.uniform(k2, shape, dtype=jnp.float32)
    transformed_gt = jax.random.uniform(k3, shape, dtype=jnp.float32)

    # block_rows=8 -> 2 grid steps at this size (exercises the parallel grid).
    out = hazy_loss(prediction, truth, transformed_gt, block_rows=8)
    out = jax.block_until_ready(out)
    ref = _reference(prediction, truth, transformed_gt)
    assert out.shape == ()
    assert jnp.allclose(out, ref, rtol=1e-5, atol=1e-6), float(jnp.abs(out - ref))

    # Awkward size: exercises the in-kernel partial-block row mask and the
    # wrapper-side <128-element flat tail (no jnp.pad anywhere).
    k4, k5, k6 = jax.random.split(jax.random.PRNGKey(1), 3)
    shape2 = (3, 7, 61)               # 1281 elems -> rows=10 (partial block), tail=1
    p2 = jax.random.normal(k4, shape2, dtype=jnp.float32)
    t2 = jax.random.uniform(k5, shape2, dtype=jnp.float32)
    g2 = jax.random.uniform(k6, shape2, dtype=jnp.float32)
    out2 = jax.block_until_ready(hazy_loss(p2, t2, g2, block_rows=8))
    ref2 = _reference(p2, t2, g2)
    assert jnp.allclose(out2, ref2, rtol=1e-5, atol=1e-6), float(jnp.abs(out2 - ref2))

    print("KERNEL_OK")
</pallas_src>

<mosaic_0001>
module attributes {stable_mosaic.version = 11 : i64} {
  func.func @_hazy_loss_kernel(%arg0: i32, %arg1: memref<8x128xf32, #tpu.memory_space<vmem>>, %arg2: memref<8x128xf32, #tpu.memory_space<vmem>>, %arg3: memref<8x128xf32, #tpu.memory_space<vmem>>, %arg4: memref<8x128xf32, #tpu.memory_space<vmem>>) attributes {dimension_semantics = [#tpu.dimension_semantics<parallel>], iteration_bounds = array<i64: 2>, scalar_prefetch = 0 : i64, scratch_operands = 0 : i64, tpu.core_type = #tpu.core_type<tc>, window_params = [{transform_indices = @transform_0, window_bounds = array<i64: 8, 128>}, {transform_indices = @transform_1, window_bounds = array<i64: 8, 128>}, {transform_indices = @transform_2, window_bounds = array<i64: 8, 128>}, {transform_indices = @transform_3, window_bounds = array<i64: 8, 128>}]} {
    %c0 = arith.constant 0 : index
    %c0_0 = arith.constant 0 : index
    %0 = vector.load %arg1[%c0, %c0_0] : memref<8x128xf32, #tpu.memory_space<vmem>>, vector<8x128xf32>
    %c0_1 = arith.constant 0 : index
    %c0_2 = arith.constant 0 : index
    %1 = vector.load %arg2[%c0_1, %c0_2] : memref<8x128xf32, #tpu.memory_space<vmem>>, vector<8x128xf32>
    %c0_3 = arith.constant 0 : index
    %c0_4 = arith.constant 0 : index
    %2 = vector.load %arg3[%c0_3, %c0_4] : memref<8x128xf32, #tpu.memory_space<vmem>>, vector<8x128xf32>
    %3 = math.absf %0 : vector<8x128xf32>
    %cst = arith.constant 0.000000e+00 : f32
    %4 = vector.broadcast %cst : f32 to vector<8x128xf32>
    %5 = arith.subf %4, %3 : vector<8x128xf32>
    %6 = math.exp %5 : vector<8x128xf32>
    %cst_5 = arith.constant 1.000000e+00 : f32
    %7 = vector.broadcast %cst_5 : f32 to vector<8x128xf32>
    %8 = arith.addf %7, %6 : vector<8x128xf32>
    %9 = tpu.reciprocal %8 : vector<8x128xf32> -> vector<8x128xf32>
    %cst_6 = arith.constant 0.000000e+00 : f32
    %10 = vector.broadcast %cst_6 : f32 to vector<8x128xf32>
    %11 = arith.cmpf oge, %0, %10 : vector<8x128xf32>
    %12 = arith.mulf %6, %9 : vector<8x128xf32>
    %13 = arith.select %11, %9, %12 : vector<8x128xi1>, vector<8x128xf32>
    %14 = math.log %13 : vector<8x128xf32>
    %cst_7 = arith.constant -1.000000e+02 : f32
    %15 = vector.broadcast %cst_7 : f32 to vector<8x128xf32>
    %16 = arith.maximumf %14, %15 : vector<8x128xf32>
    %cst_8 = arith.constant 1.000000e+00 : f32
    %17 = vector.broadcast %cst_8 : f32 to vector<8x128xf32>
    %18 = arith.subf %17, %13 : vector<8x128xf32>
    %19 = math.log %18 : vector<8x128xf32>
    %cst_9 = arith.constant -1.000000e+02 : f32
    %20 = vector.broadcast %cst_9 : f32 to vector<8x128xf32>
    %21 = arith.maximumf %19, %20 : vector<8x128xf32>
    %22 = arith.mulf %1, %16 : vector<8x128xf32>
    %cst_10 = arith.constant 1.000000e+00 : f32
    %23 = vector.broadcast %cst_10 : f32 to vector<8x128xf32>
    %24 = arith.subf %23, %1 : vector<8x128xf32>
    %25 = arith.mulf %24, %21 : vector<8x128xf32>
    %26 = arith.addf %22, %25 : vector<8x128xf32>
    %cst_11 = arith.constant 0.000000e+00 : f32
    %27 = vector.broadcast %cst_11 : f32 to vector<8x128xf32>
    %28 = arith.subf %27, %26 : vector<8x128xf32>
    %cst_12 = arith.constant 2.000000e+00 : f32
    %29 = vector.broadcast %cst_12 : f32 to vector<8x128xf32>
    %30 = arith.mulf %29, %13 : vector<8x128xf32>
    %cst_13 = arith.constant 1.000000e+00 : f32
    %31 = vector.broadcast %cst_13 : f32 to vector<8x128xf32>
    %32 = arith.subf %31, %30 : vector<8x128xf32>
    %33 = arith.mulf %2, %32 : vector<8x128xf32>
    %34 = arith.addf %13, %33 : vector<8x128xf32>
    %35 = arith.mulf %28, %34 : vector<8x128xf32>
    %36 = vector.shape_cast %35 : vector<8x128xf32> to vector<1x8x128xf32>
    %cst_14 = arith.constant dense<0.000000e+00> : vector<8x128xf32>
    %37 = vector.multi_reduction <add>, %36, %cst_14 [0] : vector<1x8x128xf32> to vector<8x128xf32>
    %c0_15 = arith.constant 0 : index
    %c0_16 = arith.constant 0 : index
    %38 = vector.load %arg4[%c0_15, %c0_16] : memref<8x128xf32, #tpu.memory_space<vmem>>, vector<8x128xf32>
    tpu.vector_store %arg4[%c0_15, %c0_16], %37 {strides = array<i32>} : memref<8x128xf32, #tpu.memory_space<vmem>>, vector<8x128xf32>,
    return
  }
  func.func @transform_0(%arg0: i32) -> (i32, i32) {
    %c0_i32 = arith.constant 0 : i32
    %c0_i32_0 = arith.constant 0 : i32
    return %arg0, %c0_i32 : i32, i32
  }
  func.func @transform_1(%arg0: i32) -> (i32, i32) {
    %c0_i32 = arith.constant 0 : i32
    %c0_i32_0 = arith.constant 0 : i32
    return %arg0, %c0_i32 : i32, i32
  }
  func.func @transform_2(%arg0: i32) -> (i32, i32) {
    %c0_i32 = arith.constant 0 : i32
    %c0_i32_0 = arith.constant 0 : i32
    return %arg0, %c0_i32 : i32, i32
  }
  func.func @transform_3(%arg0: i32) -> (i32, i32) {
    %c0_i32 = arith.constant 0 : i32
    %c0_i32_0 = arith.constant 0 : i32
    return %arg0, %c0_i32 : i32, i32
  }
}

</mosaic_0001>

<bundles_post_ra>
// kernel: tpu_custom_call.1
= control target key start
LH: loop header
LB: loop body
LE: loop exit
PB: predicated region body
PF: predicated region fallthrough
CT: control target
= control target key end

     0   :  { %s882_s0 = inlined_call_operand.hbm [shape: f32[16,128], index: 0, kind: input, shape index: {}]   ;;  %s883_s1 = inlined_call_operand.hbm [shape: f32[16,128], index: 1, kind: input, shape index: {}]   ;;  %s884_s2 = inlined_call_operand.hbm [shape: f32[16,128], index: 2, kind: input, shape index: {}]   ;;  %s885_s3 = inlined_call_operand.hbm [shape: f32[16,128], index: 3, kind: output, shape index: {}]  }
   0x1   :  { %889 = sst [smem:[#allocation13_spill]] %s882_s0 }
   0x2   :  { %890 = sst [smem:[#allocation14_spill]] %s883_s1 }
   0x3   :  { %8 = vsyncpa [#allocation3], 0 }
   0x4   :  { %10 = vsyncpa [#allocation3 + $0x1], 0 }
   0x5   :  { %11 = vsyncpa [#allocation6], 0 }
   0x6   :  { %13 = vsyncpa [#allocation6 + $0x1], 0 }
   0x7   :  { %14 = vsyncpa [#allocation4], 0 }
   0x8   :  { %16 = vsyncpa [#allocation4 + $0x1], 0  ;;  %s675_s12 = smov 0   ;;  %s677_s13 = smov 0  }
   0x9   :  { %s679_s14 = smov 0   ;;  %s681_s15 = smov 0  }
   0xa LB: > { %s696_s16 = sadd.s32 4294967295, %s649_s15   ;;  %s415_s17 = sadd.s32 4294967294, %s649_s15   ;;  %s649_s15 = sphi %s681_s15, %s911_s15   ;;  %s645_s14 = sphi %s679_s14, %s910_s14   ;;  %s641_s13 = sphi %s677_s13, %s909_s13   ;;  %s637_s12 = sphi %s675_s12, %s908_s12  }
   0xb   : > { %s700_s18 = sadd.s32 1, %s649_s15   ;;  %s29_s19 = sadd.s32 1, %s645_s14 }
   0xc   : > { %s26_s20 = ssub.s32 %s649_s15, %s700_s18  ;;  %p36_p0 = scmp.ne.s32.totalorder %s645_s14, %s641_s13 }
   0xd   : > { %p27_p1 = scmp.eq.s32.totalorder %s26_s20, 0  ;;  %p37_p2 = scmp.eq.s32.totalorder %s649_s15, 0 }
   0xe   : > { %p42_p3 = scmp.ne.s32.totalorder %s641_s13, %s637_s12  ;;  %p43_p4 = scmp.eq.s32.totalorder %s696_s16, 0 }
   0xf   : > { %s712_s21 = scalar_select %p27_p1, %s645_s14, %s29_s19  }
  0x10   : > { %p38_p5 = por %p37_p2, %p36_p0  ;;  %p714_p6 = por %p43_p4, %p42_p3 }
  0x11   : > { %891 = sst [smem:[#allocation12_spill]] %s712_s21  ;;  %p118_p7 = scmp.eq.s32.totalorder %s696_s16, 1 }
  0x12   : > { %s892_s22 = scalar_select %p714_p6, 1, 0 }
  0x13   : > { %p124_p8 = scmp.eq.s32.totalorder %s415_s17, 1  ;;  %p455_p10 = scmp.lt.s32.totalorder %s649_s15, 2 }
  0x14   : > { %p721_p11 = por %p118_p7, %p36_p0  ;;  %s886_s25 = sand.u32 1, %s645_s14  }
  0x15   : > { %p725_p12 = por %p124_p8, %p42_p3  ;;  %s731_s26 = sshll.u32 %s649_s15, 7 }
  0x16   : > { %s893_s23 = scalar_select %p721_p11, 1, 0 }
  0x17   : > { %s894_s24 = scalar_select %p725_p12, 1, 0 }
  0x18   : > { %s735_s27 = sshll.u32 %s886_s25, 3  ;;  %p737_p13 = pnand %p455_p10, %p38_p5 }
  0x19   : > { %s162_s29 = sand.u32 1, %s649_s15   ;;  %s896_s1 = sld [smem:[#allocation14_spill]] }
  0x1a   : > { %s166_s6 = scalar_lea.vmem [#allocation5], %s735_s27  ;;  %s750_s8 = scalar_lea.sflag [#allocation6], %s162_s29 }
  0x1b   : > { %s173_s7 = sshll.u32 %s166_s6, 4  ;;  %p756_p2 = pneg %p737_p13  ;;  %s174_s7 = int_to_ptr.vmem [resolvable:$true] %s173_s7 }
  0x1f   : > { %s746_s5 = scalar_lea.hbm %s896_s1, %s731_s26  ;;  %s502_s19 = scalar_lea.hbm %s896_s1, 256 }
  0x20   : > { %s497_s9 = scalar_lea.hbm %s746_s5, 128  ;;  %p503_p5 = scmp.lt.s32.totalorder %s746_s5, %s896_s1 }
  0x21   : > { %p498_p1 = scmp.ne.s32.totalorder %s746_s5, %s497_s9  ;;  %p504_p7 = scmp.lt.s32.totalorder %s502_s19, %s497_s9 }
  0x23   : > { %p500_p3 = pnand %p756_p2, %p498_p1  ;;  %p505_p8 = por %p504_p7, %p503_p5 }
  0x25   : > { %p501_p4 = pneg %p500_p3 }
  0x27   : > { %p506_p10 = pnand %p505_p8, %p501_p4 }
  0x29   : > { %509 = shalt.err (!%p506_p10)
}
  0x2a   : > { %s510_s29 = scalar_lea.vmem %s174_s7, 128  ;;  %s651_s4 = smov [#allocation5]  }
  0x2b   : > { %p511_p9 = scmp.ne.s32.totalorder %s174_s7, %s510_s29  ;;  %s515_s6 = sshll.u32 %s651_s4, 4  ;;  %s516_s6 = int_to_ptr.vmem [resolvable:$false] %s515_s6 }
  0x2c   : > { %s517_s25 = scalar_lea.vmem %s516_s6, 256  ;;  %p518_p1 = scmp.lt.s32.totalorder %s174_s7, %s516_s6 }
  0x2d   : > { %p513_p0 = pnand %p511_p9, %p756_p2  ;;  %p519_p3 = scmp.lt.s32.totalorder %s517_s25, %s510_s29 }
  0x2f   : > { %p514_p12 = pneg %p513_p0  ;;  %p520_p11 = por %p519_p3, %p518_p1 }
  0x31   : > { %p521_p6 = pnand %p520_p11, %p514_p12 }
  0x33   : > { %524 = shalt.err (!%p521_p6)
}
  0x34   : > { %447 = dma.hbm_to_vmem [thread:$0]  (!%p737_p13), %s746_s5, 128, %s174_s7, %s750_s8  }
  0x35   : > { %p196_p9 = scmp.lt.s32.totalorder %s649_s15, 3  ;;  %s898_s0 = sld [smem:[#allocation13_spill]] }
  0x36   : > { %p899_p0 = scmp.ge.s32.totalorder %s649_s15, 1  ;;  %s148_s19 = scalar_lea.vmem [#allocation2], %s735_s27 }
  0x37   : > { %s155_s20 = sshll.u32 %s148_s19, 4  ;;  %s901_s30 = sand.u32 1, %s645_s14   ;;  %s156_s20 = int_to_ptr.vmem [resolvable:$true] %s155_s20 }
  0x38   : > { %p784_p6 = pnand %p899_p0, %p196_p9  ;;  %s145_s29 = scalar_lea.sflag [#allocation3], %s901_s30 }
  0x3a   : > { %s900_s25 = scalar_select %p784_p6, 1, 0 }
  0x3b   : > { %s780_s17 = scalar_lea.hbm %s898_s0, %s731_s26  ;;  %s530_s6 = scalar_lea.hbm %s898_s0, 256 }
  0x3c   : > { %s525_s5 = scalar_lea.hbm %s780_s17, 128  ;;  %p531_p5 = scmp.lt.s32.totalorder %s780_s17, %s898_s0 }
  0x3d   : > { %p526_p11 = scmp.ne.s32.totalorder %s780_s17, %s525_s5  ;;  %p532_p7 = scmp.lt.s32.totalorder %s530_s6, %s525_s5 }
  0x3f   : > { %p528_p12 = pnand %p526_p11, %p756_p2  ;;  %p533_p8 = por %p532_p7, %p531_p5 }
  0x41   : > { %p529_p4 = pneg %p528_p12 }
  0x43   : > { %p534_p10 = pnand %p533_p8, %p529_p4 }
  0x45   : > { %537 = shalt.err (!%p534_p10)
}
  0x46   : > { %s538_s19 = scalar_lea.vmem %s156_s20, 128  ;;  %s652_s30 = smov [#allocation2]  }
  0x47   : > { %p539_p1 = scmp.ne.s32.totalorder %s156_s20, %s538_s19  ;;  %s543_s1 = sshll.u32 %s652_s30, 4  ;;  %s544_s1 = int_to_ptr.vmem [resolvable:$false] %s543_s1 }
  0x48   : > { %s545_s21 = scalar_lea.vmem %s544_s1, 256  ;;  %p546_p0 = scmp.lt.s32.totalorder %s156_s20, %s544_s1 }
  0x49   : > { %p541_p3 = pnand %p539_p1, %p756_p2  ;;  %p547_p11 = scmp.lt.s32.totalorder %s545_s21, %s538_s19 }
  0x4b   : > { %p542_p9 = pneg %p541_p3  ;;  %p548_p12 = por %p547_p11, %p546_p0 }
  0x4d   : > { %p549_p6 = pnand %p548_p12, %p542_p9 }
  0x4f   : > { %552 = shalt.err (!%p549_p6)
}
  0x50   : > { %444 = dma.hbm_to_vmem [thread:$0]  (!%p737_p13), %s780_s17, 128, %s156_s20, %s145_s29  }
  0x51   : > { %s189_s4 = scalar_lea.hbm %s884_s2, %s731_s26  ;;  %s184_s6 = scalar_lea.vmem [#allocation7], %s735_s27 }
  0x52   : > { %s191_s9 = sshll.u32 %s184_s6, 4  ;;  %s553_s11 = scalar_lea.hbm %s189_s4, 128  ;;  %s192_s9 = int_to_ptr.vmem [resolvable:$true] %s191_s9 }
  0x53   : > { %p554_p4 = scmp.ne.s32.totalorder %s189_s4, %s553_s11  ;;  %s558_s19 = scalar_lea.hbm %s884_s2, 256 }
  0x54   : > { %p559_p6 = scmp.lt.s32.totalorder %s189_s4, %s884_s2  ;;  %p560_p8 = scmp.lt.s32.totalorder %s558_s19, %s553_s11 }
  0x55   : > { %p556_p5 = pnand %p554_p4, %p756_p2 }
  0x56   : > { %p561_p10 = por %p560_p8, %p559_p6 }
  0x57   : > { %p557_p7 = pneg %p556_p5 }
  0x59   : > { %p562_p1 = pnand %p561_p10, %p557_p7 }
  0x5b   : > { %565 = shalt.err (!%p562_p1)
}
  0x5c   : > { %s566_s26 = scalar_lea.vmem %s192_s9, 128  ;;  %s653_s27 = smov [#allocation7]  }
  0x5d   : > { %p567_p3 = scmp.ne.s32.totalorder %s192_s9, %s566_s26  ;;  %s571_s17 = sshll.u32 %s653_s27, 4  ;;  %s572_s17 = int_to_ptr.vmem [resolvable:$false] %s571_s17 }
  0x5e   : > { %s573_s20 = scalar_lea.vmem %s572_s17, 256  ;;  %p574_p11 = scmp.lt.s32.totalorder %s192_s9, %s572_s17 }
  0x5f   : > { %p569_p9 = pnand %p567_p3, %p756_p2  ;;  %p575_p12 = scmp.lt.s32.totalorder %s573_s20, %s566_s26 }
  0x61   : > { %p570_p0 = pneg %p569_p9  ;;  %p576_p4 = por %p575_p12, %p574_p11 }
  0x63   : > { %p577_p5 = pnand %p576_p4, %p570_p0 }
  0x65   : > { %580 = shalt.err (!%p577_p5)
}
  0x66   : > { %450 = dma.hbm_to_vmem [thread:$0]  (!%p737_p13), %s189_s4, 128, %s192_s9, %s750_s8  }
  0x67   : > { %p902_p7 = scmp.ne.s32.totalorder %s900_s25, 0 }
  0x68   : > { %s828_s0 = sand.u32 (!%p902_p7), 1, %s641_s13   ;;  %p903_p2 = scmp.ne.s32.totalorder (!%p902_p7), %s892_s22, 0 }
  0x69   : > { %200 = sbr.rel (%p902_p7) target bundleno = 195 (0xc3), region = 32  ;;  %s831_s10 = sshll.u32 (!%p902_p7), %s828_s0, 3 }
  0x6a   : > { %s203_s29 = scalar_lea.sflag (!%p902_p7), [#allocation3], %s828_s0  ;;  %s206_s5 = scalar_lea.vmem (!%p902_p7), [#allocation2], %s831_s10 }
  0x6e   : > { %624 = dma.done.wait (%p903_p2), %s203_s29, 128  }
  0x6f   : > { %626 = vsyncadd (%p903_p2), %s203_s29, 4294967168  ;;  %s211_s28 = sand.u32 1, %s696_s16   ;;  %s215_s25 = scalar_lea.vmem [#allocation5], %s831_s10 }
  0x70   : > { %s212_s8 = scalar_lea.sflag [#allocation6], %s211_s28 }
  0x71   : > { %628 = dma.done.wait (%p903_p2), %s212_s8, 256  }
  0x72   : > { %630 = vsyncadd (%p903_p2), %s212_s8, 4294967040  ;;  %v257_v0 = vld [vmem:[%s206_s5] sm:$0xff]  ;;  %v258_v12 = vld [vmem:[%s215_s25] sm:$0xff]  ;;  %s224_s22 = scalar_lea.vmem [#allocation7], %s831_s10  ;;  %s256_s7 = scalar_lea.vmem [#allocation8], %s831_s10 }
  0x73   : > { %v260_v1 = vand.u32 2147483647, %v257_v0  ;;  %vm266_vm0 = vcmp.ge.f32.partialorder %v257_v0, 0.0  ;;  %v259_v16 = vld [vmem:[%s224_s22] sm:$0xff]  ;;  %v277_v19 = vsub.f32 1.0, %v258_v12  ;;  %s302_s4 = sshll.u32 %s256_s7, 4  ;;  %s303_s4 = int_to_ptr.vmem [resolvable:$true] %s302_s4 }
  0x74   : > { %s430_s6 = sshll.u32 %s696_s16, 7  ;;  %s289_s21 = scalar_lea.sflag [#allocation4], %s828_s0 }
  0x75   : > { %v261_v2 = vsub.f32 0.0, %v260_v1  ;;  %s300_s1 = scalar_lea.hbm %s885_s3, %s430_s6  ;;  %s581_s19 = scalar_lea.vmem %s303_s4, 128 }
  0x76   : > { %p582_p13 = scmp.ne.s32.totalorder %s303_s4, %s581_s19  ;;  %p904_p6 = scmp.ne.s32.totalorder %s893_s23, 0 }
  0x77   : > { %v262_v3 = vmul.f32 1.442695, %v261_v2  ;;  %s654_s30 = smov [#allocation8]  }
  0x78   : > { %p583_p8 = pnand %p582_p13, %p904_p6  ;;  %s585_s26 = sshll.u32 %s654_s30, 4  ;;  %s586_s26 = int_to_ptr.vmem [resolvable:$false] %s585_s26 }
  0x79   : > { %489 = vpow2.f32 %v262_v3  ;;  %s587_s27 = scalar_lea.vmem %s586_s26, 256  ;;  %p588_p1 = scmp.lt.s32.totalorder %s303_s4, %s586_s26 }
  0x7a   : > { %p584_p10 = pneg %p583_p8  ;;  %p589_p3 = scmp.lt.s32.totalorder %s587_s27, %s581_s19 }
  0x7c   : > { %p590_p9 = por %p589_p3, %p588_p1 }
  0x7e   : > { %p591_p0 = pnand %p590_p9, %p584_p10 }
  0x86   : > { %v490_v4 = vpop.eup %489 }
  0x87   : > { %v264_v5 = vadd.f32 1.0, %v490_v4 }
  0x89   : > { %491 = vrcp.f32 %v264_v5 }
  0x96   : > { %v492_v6 = vpop.eup %491 }
  0x97   : > { %v267_v7 = vmul.f32 %v492_v6, %v490_v4 }
  0x99   : > { %v268_v8 = vsel %vm266_vm0, %v492_v6, %v267_v7 }
  0x9a   : > { %493 = vlog2.f32 %v268_v8  ;;  %v272_v9 = vsub.f32 1.0, %v268_v8  ;;  %v281_v10 = vmul.f32 2.0, %v268_v8 }
  0x9c   : > { %495 = vlog2.f32 %v272_v9  ;;  %v282_v14 = vsub.f32 1.0, %v281_v10 }
  0x9e   : > { %v283_v22 = vmul.f32 %v282_v14, %v259_v16 }
  0xa0   : > { %v284_v25 = vadd.f32 %v283_v22, %v268_v8 }
  0xa7   : > { %v494_v11 = vpop.eup %493 }
  0xa8   : > { %v270_v13 = vmul.f32 0.6931472, %v494_v11 }
  0xa9   : > { %v496_v15 = vpop.eup %495 }
  0xaa   : > { %v271_v17 = vmax.f32 %v270_v13, -100.0  ;;  %v274_v18 = vmul.f32 0.6931472, %v496_v15 }
  0xac   : > { %v275_v20 = vmax.f32 %v274_v18, -100.0  ;;  %v276_v21 = vmul.f32 %v271_v17, %v258_v12 }
  0xae   : > { %v278_v23 = vmul.f32 %v277_v19, %v275_v20 }
  0xb0   : > { %v279_v24 = vadd.f32 %v278_v23, %v276_v21 }
  0xb2   : > { %v280_v26 = vsub.f32 0.0, %v279_v24 }
  0xb4   : > { %v285_v27 = vmul.f32 %v284_v25, %v280_v26 }
  0xb6   : > { %287 = vst [vmem:[%s256_s7] sm:$0xff] %v285_v27 }
  0xb7   : > { %594 = shalt.err (!%p591_p0)
}
  0xb8   : > { %s595_s16 = scalar_lea.hbm %s300_s1, 128  ;;  %s599_s0 = scalar_lea.hbm %s885_s3, 256 }
  0xb9   : > { %p596_p11 = scmp.ne.s32.totalorder %s300_s1, %s595_s16  ;;  %p600_p5 = scmp.lt.s32.totalorder %s300_s1, %s885_s3 }
  0xba   : > { %p601_p7 = scmp.lt.s32.totalorder %s599_s0, %s595_s16 }
  0xbb   : > { %p597_p12 = pnand %p596_p11, %p904_p6 }
  0xbc   : > { %p602_p2 = por %p601_p7, %p600_p5 }
  0xbd   : > { %p598_p4 = pneg %p597_p12 }
  0xbf   : > { %p603_p13 = pnand %p602_p2, %p598_p4 }
  0xc1   : > { %606 = shalt.err (!%p603_p13)
}
  0xc2   : > { %439 = dma.vmem_to_hbm [thread:$0]  (%p904_p6), %s303_s4, 128, %s300_s1, %s289_s21  }
  0xc3 PF: > { %s314_s5 = sand.u32 1, %s637_s12   ;;  %p905_p8 = scmp.ne.s32.totalorder %s894_s24, 0 }
  0xc4   : > { %p906_p10 = scmp.ge.s32.totalorder %s649_s15, 2  ;;  %s315_s28 = scalar_lea.sflag [#allocation4], %s314_s5 }
  0xc6   : > { %p452_p1 = pnand %p906_p10, %p905_p8 }
  0xc8   : > { %p453_p3 = pneg %p452_p1 }
  0xca   : > { %632 = dma.done.wait (%p453_p3), %s315_s28, 128  }
  0xcb   : > { %634 = vsyncadd (%p453_p3), %s315_s28, 4294967168  ;;  %s907_s8 = sld [smem:[#allocation12_spill]]  ;;  %p19_p9 = scmp.ge.s32.totalorder %s700_s18, 4  }
  0xcc   : > { %s908_s12 = smov %s641_s13  ;;  %s909_s13 = smov %s645_s14 }
  0xcd   : > { %s911_s15 = smov %s700_s18  ;;  %21 = sbr.rel (!%p19_p9) target bundleno = 10 (0xa), region = 101 }
  0xd1   : > { %s910_s14 = smov %s907_s8 }
  0xd2   :  { %320 = vsyncpa [#allocation3], 1 }
  0xd3   :  { %322 = vsyncpa [#allocation3 + $0x1], 1 }
  0xd4   :  { %323 = vsyncpa [#allocation6], 1 }
  0xd5   :  { %325 = vsyncpa [#allocation6 + $0x1], 1 }
  0xd6   :  { %326 = vsyncpa [#allocation4], 1 }
  0xd7   :  { %328 = vsyncpa [#allocation4 + $0x1], 1 }

</bundles_post_ra>
